<compile_context>
chip_gen: v7x
topology: tpu7x:2x2x1
jax: 0.10.0
libtpu: 0.0.40
codegen_flags: <defaults>
</compile_context>

<pallas_src>
import jax
import jax.numpy as jnp
from jax.experimental import pallas as pl
from jax.experimental.pallas import tpu as pltpu

HIDDEN = 256


def _critic_kernel(sa_ref, w_ref, w3_ref, b_ref, out_ref):
    sa_pad = sa_ref.shape[1]                       # static

    # ---- layer 1, both heads fused (single MXU push): h = relu(sa@W1 + b1||b4)
    sa = sa_ref[...].astype(jnp.bfloat16)          # [B, SA_pad] bf16
    w1 = w_ref[0:sa_pad, :]                        # [SA_pad, 512] bf16
    h = jnp.dot(sa, w1, preferred_element_type=jnp.float32)     # [B, 512] f32
    h = jnp.maximum(h + b_ref[0:1, :], 0.0)

    # ---- layer 2: per-head 256x256 bf16 dots (native MXU tiles)
    h1 = h[:, :HIDDEN].astype(jnp.bfloat16)
    h2 = h[:, HIDDEN:].astype(jnp.bfloat16)
    w2a = w_ref[sa_pad:sa_pad + HIDDEN, 0:HIDDEN]          # [256, 256] bf16
    w2b = w_ref[sa_pad:sa_pad + HIDDEN, HIDDEN:2 * HIDDEN]  # [256, 256] bf16
    g1 = jnp.dot(h1, w2a, preferred_element_type=jnp.float32)
    g2 = jnp.dot(h2, w2b, preferred_element_type=jnp.float32)
    g1r = jnp.maximum(g1 + b_ref[1:2, :HIDDEN], 0.0).astype(jnp.bfloat16)
    g2r = jnp.maximum(g2 + b_ref[1:2, HIDDEN:], 0.0).astype(jnp.bfloat16)

    # ---- layer 3, both heads via block-structured [512, 2] weight, no concat
    q = (jnp.dot(g1r, w3_ref[0:HIDDEN, :], preferred_element_type=jnp.float32)
         + jnp.dot(g2r, w3_ref[HIDDEN:, :], preferred_element_type=jnp.float32)
         + b_ref[2:3, 0:2])
    out_ref[...] = q.astype(out_ref.dtype)         # [B, 2]  (q1 | q2)


def init_critic_layers(key, state_dim, action_dim):
    """nn.Linear-style init: 6 layers of (W [in, out], b [out]) in f32."""
    sa_dim = state_dim + action_dim
    dims = [(sa_dim, HIDDEN), (HIDDEN, HIDDEN), (HIDDEN, 1),
            (sa_dim, HIDDEN), (HIDDEN, HIDDEN), (HIDDEN, 1)]
    layers = []
    for fan_in, fan_out in dims:
        key, kw, kb = jax.random.split(key, 3)
        bound = 1.0 / float(fan_in) ** 0.5
        w = jax.random.uniform(kw, (fan_in, fan_out), jnp.float32, -bound, bound)
        b = jax.random.uniform(kb, (fan_out,), jnp.float32, -bound, bound)
        layers.append((w, b))
    return layers


def pack_critic_params(layers, state_dim, action_dim):
    """Pack 12 per-layer tensors into 3 kernel operands (weights bf16)."""
    (w1, b1), (w2, b2), (w3, b3), (w4, b4), (w5, b5), (w6, b6) = layers
    sa_dim = state_dim + action_dim
    sa_pad = ((sa_dim + 7) // 8) * 8               # sublane-align W2 section

    # Layer-1 heads side by side, zero-padded rows to sa_pad.
    w14 = jnp.concatenate([w1, w4], axis=1)                      # [SA, 512]
    w14 = jnp.pad(w14, ((0, sa_pad - sa_dim), (0, 0)))
    # Layer-2 heads side by side.
    w25 = jnp.concatenate([w2, w5], axis=1)                      # [256, 512]
    w_slab = jnp.concatenate([w14, w25], axis=0).astype(jnp.bfloat16)

    # Layer-3 block-structured weight: [512, 2].
    w36 = jnp.zeros((2 * HIDDEN, 2), jnp.float32)
    w36 = w36.at[:HIDDEN, 0:1].set(w3).at[HIDDEN:, 1:2].set(w6)
    w36 = w36.astype(jnp.bfloat16)

    # All six biases in one f32 slab [3, 512].
    b_slab = jnp.zeros((3, 2 * HIDDEN), jnp.float32)
    b_slab = b_slab.at[0, :HIDDEN].set(b1).at[0, HIDDEN:].set(b4)
    b_slab = b_slab.at[1, :HIDDEN].set(b2).at[1, HIDDEN:].set(b5)
    b_slab = b_slab.at[2, 0].set(b3[0]).at[2, 1].set(b6[0])

    return w_slab, w36, b_slab, sa_pad


def critic_forward(state, action, packed):
    """Pallas equivalent of Critic.forward -> (q1, q2), each [B, 1]."""
    w_slab, w36, b_slab, sa_pad = packed
    B, sd = state.shape
    ad = action.shape[1]

    sa = jnp.concatenate([state, action], axis=1)                # [B, SA]
    if sa_pad > sd + ad:
        sa = jnp.pad(sa, ((0, 0), (0, sa_pad - (sd + ad))))      # [B, SA_pad]

    flops = 2 * B * (sa_pad * 2 * HIDDEN + 2 * HIDDEN * HIDDEN + 2 * HIDDEN * 2)
    operands = (sa, w_slab, w36, b_slab)
    bytes_accessed = sum(int(x.size) * x.dtype.itemsize for x in operands) + B * 2 * 4

    vmem = pl.BlockSpec(memory_space=pltpu.MemorySpace.VMEM)
    q = pl.pallas_call(
        _critic_kernel,
        out_shape=jax.ShapeDtypeStruct((B, 2), jnp.float32),
        in_specs=[vmem] * 4,
        out_specs=vmem,
        cost_estimate=pl.CostEstimate(flops=flops, transcendentals=0,
                                      bytes_accessed=bytes_accessed),
    )(*operands)
    return q[:, 0:1], q[:, 1:2]


def critic_forward_ref(state, action, layers):
    """Pure-JAX reference mirroring Critic.forward with the same precision the
    kernel uses (bf16 weights AND bf16 matmul inputs, f32 accumulation)."""
    bf = lambda x: x.astype(jnp.bfloat16)
    dot = lambda x, w: jnp.dot(bf(x), bf(w), preferred_element_type=jnp.float32)
    (w1, b1), (w2, b2), (w3, b3), (w4, b4), (w5, b5), (w6, b6) = layers
    sa = jnp.concatenate([state, action], axis=1)
    h = jax.nn.relu(dot(sa, w1) + b1)
    h = jax.nn.relu(dot(h, w2) + b2)
    q1 = dot(h, w3) + b3
    g = jax.nn.relu(dot(sa, w4) + b4)
    g = jax.nn.relu(dot(g, w5) + b5)
    q2 = dot(g, w6) + b6
    return q1, q2


if __name__ == "__main__":
    key = jax.random.PRNGKey(0)
    k_params, k_state, k_action = jax.random.split(key, 3)

    batch, state_dim, action_dim = 8, 24, 8

    layers = init_critic_layers(k_params, state_dim, action_dim)
    packed = pack_critic_params(layers, state_dim, action_dim)
    state = jax.random.normal(k_state, (batch, state_dim), jnp.float32)
    action = jax.random.normal(k_action, (batch, action_dim), jnp.float32)

    q1, q2 = critic_forward(state, action, packed)
    jax.block_until_ready((q1, q2))

    q1_ref, q2_ref = critic_forward_ref(state, action, layers)
    assert q1.shape == (batch, 1) and q2.shape == (batch, 1)
    assert jnp.allclose(q1, q1_ref, atol=1e-3, rtol=1e-3), \
        float(jnp.max(jnp.abs(q1 - q1_ref)))
    assert jnp.allclose(q2, q2_ref, atol=1e-3, rtol=1e-3), \
        float(jnp.max(jnp.abs(q2 - q2_ref)))

    print("KERNEL_OK")
</pallas_src>

<mosaic_0001>
module attributes {stable_mosaic.version = 11 : i64} {
  func.func @_critic_kernel(%arg0: memref<8x32xf32, #tpu.memory_space<vmem>>, %arg1: memref<288x512xbf16, #tpu.memory_space<vmem>>, %arg2: memref<512x2xbf16, #tpu.memory_space<vmem>>, %arg3: memref<3x512xf32, #tpu.memory_space<vmem>>, %arg4: memref<8x2xf32, #tpu.memory_space<vmem>>) attributes {dimension_semantics = [], scalar_prefetch = 0 : i64, scratch_operands = 0 : i64, tpu.core_type = #tpu.core_type<tc>} {
    %c0 = arith.constant 0 : index
    %c0_0 = arith.constant 0 : index
    %0 = vector.load %arg0[%c0, %c0_0] : memref<8x32xf32, #tpu.memory_space<vmem>>, vector<8x32xf32>
    %1 = arith.truncf %0 : vector<8x32xf32> to vector<8x32xbf16>
    %c0_1 = arith.constant 0 : index
    %c0_2 = arith.constant 0 : index
    %2 = vector.load %arg1[%c0_1, %c0_2] : memref<288x512xbf16, #tpu.memory_space<vmem>>, vector<32x512xbf16>
    %cst = arith.constant dense<0.000000e+00> : vector<8x512xf32>
    %3 = tpu.matmul %1, %2, %cst {dimension_numbers = #tpu.dot_dimension_numbers<[1], [0], [0], [1], [0, 0, 1, 1], [], []>} : vector<8x32xbf16>, vector<32x512xbf16>, vector<8x512xf32> -> vector<8x512xf32>
    %c0_3 = arith.constant 0 : index
    %c0_4 = arith.constant 0 : index
    %4 = vector.load %arg3[%c0_3, %c0_4] : memref<3x512xf32, #tpu.memory_space<vmem>>, vector<1x512xf32>
    %5 = vector.broadcast %4 : vector<1x512xf32> to vector<8x512xf32>
    %6 = arith.addf %3, %5 : vector<8x512xf32>
    %cst_5 = arith.constant 0.000000e+00 : f32
    %7 = vector.broadcast %cst_5 : f32 to vector<8x512xf32>
    %8 = arith.maximumf %6, %7 : vector<8x512xf32>
    %9 = vector.extract_strided_slice %8 {offsets = [0, 0], sizes = [8, 256], strides = [1, 1]} : vector<8x512xf32> to vector<8x256xf32>
    %10 = arith.truncf %9 : vector<8x256xf32> to vector<8x256xbf16>
    %11 = vector.extract_strided_slice %8 {offsets = [0, 256], sizes = [8, 256], strides = [1, 1]} : vector<8x512xf32> to vector<8x256xf32>
    %12 = arith.truncf %11 : vector<8x256xf32> to vector<8x256xbf16>
    %c32 = arith.constant 32 : index
    %c0_6 = arith.constant 0 : index
    %13 = vector.load %arg1[%c32, %c0_6] : memref<288x512xbf16, #tpu.memory_space<vmem>>, vector<256x256xbf16>
    %c32_7 = arith.constant 32 : index
    %c256 = arith.constant 256 : index
    %14 = vector.load %arg1[%c32_7, %c256] : memref<288x512xbf16, #tpu.memory_space<vmem>>, vector<256x256xbf16>
    %cst_8 = arith.constant dense<0.000000e+00> : vector<8x256xf32>
    %15 = tpu.matmul %10, %13, %cst_8 {dimension_numbers = #tpu.dot_dimension_numbers<[1], [0], [0], [1], [0, 0, 1, 1], [], []>} : vector<8x256xbf16>, vector<256x256xbf16>, vector<8x256xf32> -> vector<8x256xf32>
    %cst_9 = arith.constant dense<0.000000e+00> : vector<8x256xf32>
    %16 = tpu.matmul %12, %14, %cst_9 {dimension_numbers = #tpu.dot_dimension_numbers<[1], [0], [0], [1], [0, 0, 1, 1], [], []>} : vector<8x256xbf16>, vector<256x256xbf16>, vector<8x256xf32> -> vector<8x256xf32>
    %c1 = arith.constant 1 : index
    %c0_10 = arith.constant 0 : index
    %17 = vector.load %arg3[%c1, %c0_10] : memref<3x512xf32, #tpu.memory_space<vmem>>, vector<1x256xf32>
    %18 = vector.broadcast %17 : vector<1x256xf32> to vector<8x256xf32>
    %19 = arith.addf %15, %18 : vector<8x256xf32>
    %cst_11 = arith.constant 0.000000e+00 : f32
    %20 = vector.broadcast %cst_11 : f32 to vector<8x256xf32>
    %21 = arith.maximumf %19, %20 : vector<8x256xf32>
    %22 = arith.truncf %21 : vector<8x256xf32> to vector<8x256xbf16>
    %c1_12 = arith.constant 1 : index
    %c256_13 = arith.constant 256 : index
    %23 = vector.load %arg3[%c1_12, %c256_13] : memref<3x512xf32, #tpu.memory_space<vmem>>, vector<1x256xf32>
    %24 = vector.broadcast %23 : vector<1x256xf32> to vector<8x256xf32>
    %25 = arith.addf %16, %24 : vector<8x256xf32>
    %cst_14 = arith.constant 0.000000e+00 : f32
    %26 = vector.broadcast %cst_14 : f32 to vector<8x256xf32>
    %27 = arith.maximumf %25, %26 : vector<8x256xf32>
    %28 = arith.truncf %27 : vector<8x256xf32> to vector<8x256xbf16>
    %c0_15 = arith.constant 0 : index
    %c0_16 = arith.constant 0 : index
    %29 = vector.load %arg2[%c0_15, %c0_16] : memref<512x2xbf16, #tpu.memory_space<vmem>>, vector<256x2xbf16>
    %cst_17 = arith.constant dense<0.000000e+00> : vector<8x2xf32>
    %30 = tpu.matmul %22, %29, %cst_17 {dimension_numbers = #tpu.dot_dimension_numbers<[1], [0], [0], [1], [0, 0, 1, 1], [], []>} : vector<8x256xbf16>, vector<256x2xbf16>, vector<8x2xf32> -> vector<8x2xf32>
    %c256_18 = arith.constant 256 : index
    %c0_19 = arith.constant 0 : index
    %31 = vector.load %arg2[%c256_18, %c0_19] : memref<512x2xbf16, #tpu.memory_space<vmem>>, vector<256x2xbf16>
    %cst_20 = arith.constant dense<0.000000e+00> : vector<8x2xf32>
    %32 = tpu.matmul %28, %31, %cst_20 {dimension_numbers = #tpu.dot_dimension_numbers<[1], [0], [0], [1], [0, 0, 1, 1], [], []>} : vector<8x256xbf16>, vector<256x2xbf16>, vector<8x2xf32> -> vector<8x2xf32>
    %33 = arith.addf %30, %32 : vector<8x2xf32>
    %c2 = arith.constant 2 : index
    %c0_21 = arith.constant 0 : index
    %34 = vector.load %arg3[%c2, %c0_21] : memref<3x512xf32, #tpu.memory_space<vmem>>, vector<1x2xf32>
    %35 = vector.broadcast %34 : vector<1x2xf32> to vector<8x2xf32>
    %36 = arith.addf %33, %35 : vector<8x2xf32>
    %c0_22 = arith.constant 0 : index
    %c0_23 = arith.constant 0 : index
    %37 = vector.load %arg4[%c0_22, %c0_23] : memref<8x2xf32, #tpu.memory_space<vmem>>, vector<8x2xf32>
    tpu.vector_store %arg4[%c0_22, %c0_23], %36 {strides = array<i32>} : memref<8x2xf32, #tpu.memory_space<vmem>>, vector<8x2xf32>,
    return
  }
}

</mosaic_0001>

<bundles_post_ra>
// kernel: tpu_custom_call.1
= control target key start
LH: loop header
LB: loop body
LE: loop exit
PB: predicated region body
PF: predicated region fallthrough
CT: control target
= control target key end

     0   :  { %9 = vsyncpa [#allocation3], 0  ;;  %s1368_s15 = smov [#allocation2]   ;;  %s1533_s0 = inlined_call_operand.vmem [shape: f32[8,32], index: 0, kind: input, shape index: {}]   ;;  %s1534_s1 = inlined_call_operand.hbm [shape: bf16[288,512], index: 1, kind: input, shape index: {}]   ;;  %s1535_s2 = inlined_call_operand.vmem [shape: bf16[512,2], index: 2, kind: input, shape index: {}]   ;;  %s1536_s3 = inlined_call_operand.vmem [shape: f32[3,512], index: 3, kind: input, shape index: {}]   ;;  %s1537_s4 = inlined_call_operand.vmem [shape: f32[8,2], index: 4, kind: output, shape index: {}]  }
   0x1   :  { %s17_s16 = sshll.u32 %s1368_s15, 4  ;;  %s1344_s19 = scalar_lea.hbm %s1534_s1, 9216  ;;  %s18_s16 = int_to_ptr.vmem [resolvable:$true] %s17_s16 }
   0x2   :  { %p1345_p0 = scmp.ne.s32.totalorder %s1534_s1, %s1344_s19  ;;  %p1348_p1 = scmp.lt.u32.totalorder %s1344_s19, %s1534_s1 }
   0x4   :  { %p1350_p2 = pnand %p1348_p1, %p1345_p0 }
   0x6   :  { %1353 = shalt.err (!%p1350_p2)
}
   0x7   :  { %s1354_s24 = scalar_lea.vmem %s18_s16, 9216  ;;  %p1359_p4 = scmp.lt.s32.totalorder %s18_s16, %s18_s16 }
   0x8   :  { %p1355_p3 = scmp.ne.s32.totalorder %s18_s16, %s1354_s24  ;;  %p1360_p5 = scmp.lt.s32.totalorder %s1354_s24, %s1354_s24 }
   0xa   :  { %p1361_p6 = por %p1360_p5, %p1359_p4 }
   0xc   :  { %p1362_p7 = pnand %p1361_p6, %p1355_p3 }
   0xe   :  { %1365 = shalt.err (!%p1362_p7)
}
   0xf   :  { %s1369_s25 = smov 256   ;;  %s1370_s26 = smov 16  }
  0x10   :  { %23 = dma.hbm_to_vmem [thread:$0]  %s1534_s1, 9216, %s18_s16, [#allocation3], %s1369_s25, %s1369_s25, %s1370_s26  }
  0x11   :  { %1366 = dma.done.wait [#allocation3], 9216  }
  0x12   :  { %1367 = vsyncadd [#allocation3], 4294958080  ;;  %v1371_v0 = vmov 0   ;;  %v1204_v1 = vld [vmem:[#allocation2 + $0x4] ss:$16 sps:$4 sm:$0xff]   ;;  %vm104_vm0 = vcmask 261120  }
  0x13   :  { %140 = vmatprep.mubr.bf16.mxu0 %v1371_v0  ;;  %181 = vmatprep.mubr.bf16.mxu1 %v1371_v0  ;;  %v1206_v2 = vld [vmem:[#allocation2 + $0xc] ss:$16 sps:$4 sm:$0xff]   ;;  %v1208_v3 = vld [vmem:[#allocation2] ss:$16 sps:$4 sm:$0xff]   ;;  %v1209_v4 = vld [vmem:[#allocation2 + $0x8] ss:$16 sps:$4 sm:$0xff]  }
  0x14   :  { %108 = vmatprep.subr.bf16.mxu0 %v1204_v1  ;;  %149 = vmatprep.subr.bf16.mxu1 %v1206_v2  ;;  %v1210_v5 = vld [vmem:[#allocation2 + $0x24] ss:$16 sps:$4 sm:$0xff]   ;;  %v1212_v6 = vld [vmem:[#allocation2 + $0x2c] ss:$16 sps:$4 sm:$0xff]   ;;  %v1214_v7 = vld [vmem:[#allocation2 + $0x20] ss:$16 sps:$4 sm:$0xff]  }
  0x15   :  { %109 = vmatpush1.bf16.msra.mxu0 %v1208_v3  ;;  %150 = vmatpush1.bf16.msra.mxu1 %v1209_v4  ;;  %v1215_v8 = vld [vmem:[#allocation2 + $0x28] ss:$16 sps:$4 sm:$0xff]   ;;  %v32_v9 = vld [vmem:[%s1533_s0] sm:$0xff]  ;;  %v1221_v14 = vld [vmem:[#allocation2 + $0x4c] ss:$16 sps:$4 sm:$0xff]   ;;  %vm1040_vm1 = vcmask 15360  }
  0x16   :  { %110 = vmatprep.subr.bf16.mxu0 %v1210_v5  ;;  %151 = vmatprep.subr.bf16.mxu1 %v1212_v6  ;;  %v1216_v10 = vld [vmem:[#allocation2 + $0x40] ss:$16 sps:$4 sm:$0xff]   ;;  %v1218_v11 = vld [vmem:[#allocation2 + $0x44] ss:$16 sps:$4 sm:$0xff]   ;;  %v33_v12 = vpack.c.bf16 %v32_v9, %v32_v9  ;;  %v1219_v13 = vld [vmem:[#allocation2 + $0x48] ss:$16 sps:$4 sm:$0xff]  }
  0x17   :  { %v1224_v15 = vld [vmem:[#allocation2 + $0x64] ss:$16 sps:$4 sm:$0xff]   ;;  %v1227_v16 = vld [vmem:[#allocation2 + $0x6c] ss:$16 sps:$4 sm:$0xff]   ;;  %v1222_v17 = vld [vmem:[#allocation2 + $0x60] ss:$16 sps:$4 sm:$0xff]  }
  0x18   :  { %v1225_v18 = vld [vmem:[#allocation2 + $0x68] ss:$16 sps:$4 sm:$0xff]   ;;  %v1230_v19 = vld [vmem:[#allocation2 + $0x84] ss:$16 sps:$4 sm:$0xff]   ;;  %v1233_v20 = vld [vmem:[#allocation2 + $0x8c] ss:$16 sps:$4 sm:$0xff]  }
  0x19   :  { %111 = vmatpush1.bf16.msra.mxu0 %v1214_v7  ;;  %152 = vmatpush1.bf16.msra.mxu1 %v1215_v8  ;;  %v1228_v21 = vld [vmem:[#allocation2 + $0x80] ss:$16 sps:$4 sm:$0xff]   ;;  %v1231_v22 = vld [vmem:[#allocation2 + $0x88] ss:$16 sps:$4 sm:$0xff]   ;;  %v1236_v23 = vld [vmem:[#allocation2 + $0xa4] ss:$16 sps:$4 sm:$0xff]  }
  0x1a   :  { %435 = vmatprep.subr.bf16.mxu0 %v1218_v11  ;;  %653 = vmatprep.subr.bf16.mxu1 %v1221_v14  ;;  %v1239_v24 = vld [vmem:[#allocation2 + $0xac] ss:$16 sps:$4 sm:$0xff]   ;;  %v1234_v25 = vld [vmem:[#allocation2 + $0xa0] ss:$16 sps:$4 sm:$0xff]   ;;  %v1237_v26 = vld [vmem:[#allocation2 + $0xa8] ss:$16 sps:$4 sm:$0xff]  }
  0x1b   :  { %v1242_v27 = vld [vmem:[#allocation2 + $0xc4] ss:$16 sps:$4 sm:$0xff]   ;;  %v1245_v28 = vld [vmem:[#allocation2 + $0xcc] ss:$16 sps:$4 sm:$0xff]   ;;  %v1240_v29 = vld [vmem:[#allocation2 + $0xc0] ss:$16 sps:$4 sm:$0xff]  }
  0x1c   :  { %1055 = vmatmul.mubr.msk.bf16.vlgmr.msra.gmra.mrb[0].mxu0 %vm104_vm0, %v33_v12  ;;  %1056 = vmatmul.mubr.msk.bf16.vlgmr.msra.gmra.mrb[0].mxu1 %vm104_vm0, %v33_v12  ;;  %v1243_v30 = vld [vmem:[#allocation2 + $0xc8] ss:$16 sps:$4 sm:$0xff]   ;;  %v1248_v31 = vld [vmem:[#allocation2 + $0xe4] ss:$16 sps:$4 sm:$0xff]   ;;  %v1251_v32 = vld [vmem:[#allocation2 + $0xec] ss:$16 sps:$4 sm:$0xff]  }
  0x1d   :  { %436 = vmatpush1.bf16.msra.mxu0 %v1216_v10  ;;  %654 = vmatpush1.bf16.msra.mxu1 %v1219_v13  ;;  %v1246_v33 = vld [vmem:[#allocation2 + $0xe0] ss:$16 sps:$4 sm:$0xff]   ;;  %v1249_v34 = vld [vmem:[#allocation2 + $0xe8] ss:$16 sps:$4 sm:$0xff]   ;;  %v1254_v35 = vld [vmem:[#allocation2 + $0x104] ss:$16 sps:$4 sm:$0xff]   ;;  %v44_v13 = vlaneseq }
  0x1e   :  { %437 = vmatprep.subr.bf16.mxu0 %v1224_v15  ;;  %655 = vmatprep.subr.bf16.mxu1 %v1227_v16  ;;  %v1257_v36 = vld [vmem:[#allocation2 + $0x10c] ss:$16 sps:$4 sm:$0xff]   ;;  %v1252_v37 = vld [vmem:[#allocation2 + $0x100] ss:$16 sps:$4 sm:$0xff]   ;;  %v1255_v38 = vld [vmem:[#allocation2 + $0x108] ss:$16 sps:$4 sm:$0xff]  }
  0x1f   :  { %v1260_v39 = vld [vmem:[#allocation2 + $0x124] ss:$16 sps:$4 sm:$0xff]   ;;  %v1263_v40 = vld [vmem:[#allocation2 + $0x12c] ss:$16 sps:$4 sm:$0xff]   ;;  %v1258_v41 = vld [vmem:[#allocation2 + $0x120] ss:$16 sps:$4 sm:$0xff]  }
  0x20   :  { %v1261_v42 = vld [vmem:[#allocation2 + $0x128] ss:$16 sps:$4 sm:$0xff]   ;;  %v1266_v43 = vld [vmem:[#allocation2 + $0x144] ss:$16 sps:$4 sm:$0xff]   ;;  %v1269_v44 = vld [vmem:[#allocation2 + $0x14c] ss:$16 sps:$4 sm:$0xff]  }
  0x21   :  { %438 = vmatpush1.bf16.msra.mxu0 %v1222_v17  ;;  %656 = vmatpush1.bf16.msra.mxu1 %v1225_v18  ;;  %v1264_v45 = vld [vmem:[#allocation2 + $0x140] ss:$16 sps:$4 sm:$0xff]   ;;  %v1267_v46 = vld [vmem:[#allocation2 + $0x148] ss:$16 sps:$4 sm:$0xff]   ;;  %v1272_v47 = vld [vmem:[#allocation2 + $0x164] ss:$16 sps:$4 sm:$0xff]  }
  0x22   :  { %439 = vmatprep.subr.bf16.mxu0 %v1230_v19  ;;  %657 = vmatprep.subr.bf16.mxu1 %v1233_v20  ;;  %v1275_v48 = vld [vmem:[#allocation2 + $0x16c] ss:$16 sps:$4 sm:$0xff]   ;;  %v1270_v49 = vld [vmem:[#allocation2 + $0x160] ss:$16 sps:$4 sm:$0xff]   ;;  %v1273_v50 = vld [vmem:[#allocation2 + $0x168] ss:$16 sps:$4 sm:$0xff]  }
  0x23   :  { %v1278_v51 = vld [vmem:[#allocation2 + $0x184] ss:$16 sps:$4 sm:$0xff]   ;;  %v1281_v52 = vld [vmem:[#allocation2 + $0x18c] ss:$16 sps:$4 sm:$0xff]   ;;  %v1276_v53 = vld [vmem:[#allocation2 + $0x180] ss:$16 sps:$4 sm:$0xff]  }
  0x24   :  { %v1279_v54 = vld [vmem:[#allocation2 + $0x188] ss:$16 sps:$4 sm:$0xff]   ;;  %v1284_v55 = vld [vmem:[#allocation2 + $0x1a4] ss:$16 sps:$4 sm:$0xff]   ;;  %v1287_v56 = vld [vmem:[#allocation2 + $0x1ac] ss:$16 sps:$4 sm:$0xff]  }
  0x25   :  { %440 = vmatpush1.bf16.msra.mxu0 %v1228_v21  ;;  %658 = vmatpush1.bf16.msra.mxu1 %v1231_v22  ;;  %v1282_v57 = vld [vmem:[#allocation2 + $0x1a0] ss:$16 sps:$4 sm:$0xff]   ;;  %v1285_v58 = vld [vmem:[#allocation2 + $0x1a8] ss:$16 sps:$4 sm:$0xff]   ;;  %v1290_v59 = vld [vmem:[#allocation2 + $0x1c4] ss:$16 sps:$4 sm:$0xff]  }
  0x26   :  { %441 = vmatprep.subr.bf16.mxu0 %v1236_v23  ;;  %659 = vmatprep.subr.bf16.mxu1 %v1239_v24  ;;  %v1293_v60 = vld [vmem:[#allocation2 + $0x1cc] ss:$16 sps:$4 sm:$0xff]   ;;  %v1288_v61 = vld [vmem:[#allocation2 + $0x1c0] ss:$16 sps:$4 sm:$0xff]   ;;  %v1291_v62 = vld [vmem:[#allocation2 + $0x1c8] ss:$16 sps:$4 sm:$0xff]  }
  0x27   :  { %v1296_v63 = vld [vmem:[#allocation2 + $0x1e4] ss:$16 sps:$4 sm:$0xff]   ;;  %v1299_v0 = vld [vmem:[#allocation2 + $0x1ec] ss:$16 sps:$4 sm:$0xff]   ;;  %v1294_v1 = vld [vmem:[#allocation2 + $0x1e0] ss:$16 sps:$4 sm:$0xff]  }
  0x28   :  { %v1297_v2 = vld [vmem:[#allocation2 + $0x1e8] ss:$16 sps:$4 sm:$0xff]   ;;  %v1302_v3 = vld [vmem:[#allocation2 + $0x204] ss:$16 sps:$4 sm:$0xff]   ;;  %v1305_v4 = vld [vmem:[#allocation2 + $0x20c] ss:$16 sps:$4 sm:$0xff]  }
  0x29   :  { %442 = vmatpush1.bf16.msra.mxu0 %v1234_v25  ;;  %660 = vmatpush1.bf16.msra.mxu1 %v1237_v26  ;;  %v1300_v5 = vld [vmem:[#allocation2 + $0x200] ss:$16 sps:$4 sm:$0xff]   ;;  %v1303_v6 = vld [vmem:[#allocation2 + $0x208] ss:$16 sps:$4 sm:$0xff]   ;;  %v1308_v7 = vld [vmem:[#allocation2 + $0x224] ss:$16 sps:$4 sm:$0xff]  }
  0x2a   :  { %443 = vmatprep.subr.bf16.mxu0 %v1242_v27  ;;  %661 = vmatprep.subr.bf16.mxu1 %v1245_v28  ;;  %v1311_v8 = vld [vmem:[#allocation2 + $0x22c] ss:$16 sps:$4 sm:$0xff]   ;;  %v1306_v9 = vld [vmem:[#allocation2 + $0x220] ss:$16 sps:$4 sm:$0xff]   ;;  %v1309_v10 = vld [vmem:[#allocation2 + $0x228] ss:$16 sps:$4 sm:$0xff]  }
  0x2b   :  { %v1312_v11 = vld [vmem:[%s1535_s2 + $0xc0] sm:$0xff]   ;;  %v45_v14 = vshrl.u32 %v44_v13, 7 }
  0x2c   :  { %v1313_v12 = vld [vmem:[%s1535_s2 + $0x40] sm:$0xff]  }
  0x2d   :  { %444 = vmatpush1.bf16.msra.mxu0 %v1240_v29  ;;  %662 = vmatpush1.bf16.msra.mxu1 %v1243_v30  ;;  %v1418_v15 = vsub.s32 0, %v45_v14  ;;  %v54_v16 = vsub.s32 2, %v45_v14  ;;  %v42_v17 = vld [vmem:[%s1536_s3] ss:$4 sm:$0xf]  ;;  %v1423_v18 = vsub.s32 1, %v45_v14 }
  0x2e   :  { %445 = vmatprep.subr.bf16.mxu0 %v1248_v31  ;;  %663 = vmatprep.subr.bf16.mxu1 %v1251_v32  ;;  %v58_v19 = vsub.s32 3, %v45_v14 }
  0x2f   :  { %v47_v20 = vrot.slane %v42_v17, %v1418_v15  ;;  %v55_v21 = vrot.slane %v42_v17, %v54_v16  ;;  %v51_v22 = vrot.slane %v42_v17, %v1423_v18 }
  0x30   :  { %v59_v23 = vrot.slane %v42_v17, %v58_v19 }
  0x31   :  { %446 = vmatpush1.bf16.msra.mxu0 %v1246_v33  ;;  %664 = vmatpush1.bf16.msra.mxu1 %v1249_v34 }
  0x32   :  { %447 = vmatprep.subr.bf16.mxu0 %v1254_v35  ;;  %665 = vmatprep.subr.bf16.mxu1 %v1257_v36 }
  0x35   :  { %448 = vmatpush1.bf16.msra.mxu0 %v1252_v37  ;;  %666 = vmatpush1.bf16.msra.mxu1 %v1255_v38 }
  0x36   :  { %449 = vmatprep.subr.bf16.mxu0 %v1260_v39  ;;  %667 = vmatprep.subr.bf16.mxu1 %v1263_v40 }
  0x39   :  { %450 = vmatpush1.bf16.msra.mxu0 %v1258_v41  ;;  %668 = vmatpush1.bf16.msra.mxu1 %v1261_v42  ;;  %v1314_v42 = vld [vmem:[%s1535_s2 + $0x80] sm:$0xff]  }
  0x3a   :  { %451 = vmatprep.subr.bf16.mxu0 %v1266_v43  ;;  %669 = vmatprep.subr.bf16.mxu1 %v1269_v44  ;;  %v1315_v43 = vld [vmem:[%s1535_s2] sm:$0xff]  }
  0x3d   :  { %452 = vmatpush1.bf16.msra.mxu0 %v1264_v45  ;;  %670 = vmatpush1.bf16.msra.mxu1 %v1267_v46  ;;  %v1316_v46 = vld [vmem:[%s1535_s2 + $0xc8] sm:$0xff]  }
  0x3e   :  { %453 = vmatprep.subr.bf16.mxu0 %v1272_v47  ;;  %671 = vmatprep.subr.bf16.mxu1 %v1275_v48  ;;  %v1317_v47 = vld [vmem:[%s1535_s2 + $0x48] sm:$0xff]  }
  0x3f   :  { %v1318_v48 = vld [vmem:[%s1535_s2 + $0x88] sm:$0xff]  }
  0x41   :  { %454 = vmatpush1.bf16.msra.mxu0 %v1270_v49  ;;  %672 = vmatpush1.bf16.msra.mxu1 %v1273_v50  ;;  %v1319_v49 = vld [vmem:[%s1535_s2 + $0x8] sm:$0xff]   ;;  %v1320_v50 = vld [vmem:[%s1535_s2 + $0xd0] sm:$0xff]  }
  0x42   :  { %455 = vmatprep.subr.bf16.mxu0 %v1278_v51  ;;  %673 = vmatprep.subr.bf16.mxu1 %v1281_v52  ;;  %v1321_v51 = vld [vmem:[%s1535_s2 + $0x50] sm:$0xff]  }
  0x43   :  { %v1322_v52 = vld [vmem:[%s1535_s2 + $0x90] sm:$0xff]  }
  0x45   :  { %456 = vmatpush1.bf16.msra.mxu0 %v1276_v53  ;;  %674 = vmatpush1.bf16.msra.mxu1 %v1279_v54  ;;  %v1323_v53 = vld [vmem:[%s1535_s2 + $0x10] sm:$0xff]   ;;  %v1324_v54 = vld [vmem:[%s1535_s2 + $0xd8] sm:$0xff]  }
  0x46   :  { %457 = vmatprep.subr.bf16.mxu0 %v1284_v55  ;;  %675 = vmatprep.subr.bf16.mxu1 %v1287_v56  ;;  %v1325_v55 = vld [vmem:[%s1535_s2 + $0x58] sm:$0xff]  }
  0x47   :  { %v1326_v56 = vld [vmem:[%s1535_s2 + $0x98] sm:$0xff]  }
  0x49   :  { %458 = vmatpush1.bf16.msra.mxu0 %v1282_v57  ;;  %676 = vmatpush1.bf16.msra.mxu1 %v1285_v58  ;;  %v1327_v57 = vld [vmem:[%s1535_s2 + $0x18] sm:$0xff]   ;;  %v1328_v58 = vld [vmem:[%s1535_s2 + $0xe0] sm:$0xff]  }
  0x4a   :  { %459 = vmatprep.subr.bf16.mxu0 %v1290_v59  ;;  %677 = vmatprep.subr.bf16.mxu1 %v1293_v60  ;;  %v1329_v59 = vld [vmem:[%s1535_s2 + $0x60] sm:$0xff]  }
  0x4b   :  { %v1330_v60 = vld [vmem:[%s1535_s2 + $0xa0] sm:$0xff]  }
  0x4d   :  { %460 = vmatpush1.bf16.msra.mxu0 %v1288_v61  ;;  %678 = vmatpush1.bf16.msra.mxu1 %v1291_v62  ;;  %v1331_v61 = vld [vmem:[%s1535_s2 + $0x20] sm:$0xff]   ;;  %v1332_v62 = vld [vmem:[%s1535_s2 + $0xe8] sm:$0xff]  }
  0x4e   :  { %461 = vmatprep.subr.bf16.mxu0 %v1296_v63  ;;  %679 = vmatprep.subr.bf16.mxu1 %v1299_v0  ;;  %v1333_v63 = vld [vmem:[%s1535_s2 + $0x68] sm:$0xff]  }
  0x4f   :  { %v1334_v0 = vld [vmem:[%s1535_s2 + $0xa8] sm:$0xff]  }
  0x51   :  { %462 = vmatpush1.bf16.msra.mxu0 %v1294_v1  ;;  %680 = vmatpush1.bf16.msra.mxu1 %v1297_v2  ;;  %v1335_v1 = vld [vmem:[%s1535_s2 + $0x28] sm:$0xff]   ;;  %v1336_v2 = vld [vmem:[%s1535_s2 + $0xf0] sm:$0xff]  }
  0x52   :  { %463 = vmatprep.subr.bf16.mxu0 %v1302_v3  ;;  %681 = vmatprep.subr.bf16.mxu1 %v1305_v4  ;;  %v1337_v3 = vld [vmem:[%s1535_s2 + $0x70] sm:$0xff]  }
  0x53   :  { %v1338_v4 = vld [vmem:[%s1535_s2 + $0xb0] sm:$0xff]  }
  0x55   :  { %464 = vmatpush1.bf16.msra.mxu0 %v1300_v5  ;;  %682 = vmatpush1.bf16.msra.mxu1 %v1303_v6  ;;  %v1339_v5 = vld [vmem:[%s1535_s2 + $0x30] sm:$0xff]   ;;  %v1340_v6 = vld [vmem:[%s1535_s2 + $0xf8] sm:$0xff]  }
  0x56   :  { %465 = vmatprep.subr.bf16.mxu0 %v1308_v7  ;;  %683 = vmatprep.subr.bf16.mxu1 %v1311_v8  ;;  %v1341_v7 = vld [vmem:[%s1535_s2 + $0x78] sm:$0xff]  }
  0x57   :  { %v1342_v8 = vld [vmem:[%s1535_s2 + $0xb8] sm:$0xff]  }
  0x59   :  { %466 = vmatpush1.bf16.msra.mxu0 %v1306_v9  ;;  %684 = vmatpush1.bf16.msra.mxu1 %v1309_v10  ;;  %v1343_v9 = vld [vmem:[%s1535_s2 + $0x38] sm:$0xff]   ;;  %v1057_v10 = vld [vmem:[%s1536_s3 + $0x1] ss:$4 sm:$0x3] }
  0x5a   :  { %1156 = vmatprep.subr.bf16.mxu0 %v1312_v11  ;;  %1178 = vmatprep.subr.bf16.mxu1 %v1313_v12  ;;  %v1090_v11 = vld [vmem:[%s1536_s3 + $0x9] ss:$4 sm:$0x3]  ;;  %v268_v12 = vrot.slane %v1057_v10, %v1418_v15  ;;  %v272_v14 = vrot.slane %v1057_v10, %v1423_v18 }
  0x5b   :  { %v486_v13 = vrot.slane %v1090_v11, %v1418_v15  ;;  %v490_v16 = vrot.slane %v1090_v11, %v1423_v18 }
  0xef   :  { %v142_v24 = vpop.f32.mrb[0].mxu0  ;;  %v183_v25 = vpop.f32.mrb[0].mxu1 }
  0xf0   :  { %v143_v26 = vadd.f32 %v142_v24, %v47_v20  ;;  %v184_v27 = vadd.f32 %v183_v25, %v55_v21  ;;  %v144_v28 = vpop.f32.mrb[1].mxu0  ;;  %v185_v29 = vpop.f32.mrb[1].mxu1 }
  0xf1   :  { %v145_v30 = vadd.f32 %v144_v28, %v51_v22  ;;  %v186_v31 = vadd.f32 %v185_v29, %v59_v23  ;;  %v146_v32 = vpop.f32.mrb[2].mxu0  ;;  %v187_v33 = vpop.f32.mrb[2].mxu1 }
  0xf2   :  { %v190_v34 = vmax.f32 %v143_v26, 0.0  ;;  %v192_v35 = vmax.f32 %v184_v27, 0.0  ;;  %v147_v36 = vpop.f32.mrb[3].mxu0  ;;  %v188_v37 = vpop.f32.mrb[3].mxu1 }
  0xf3   :  { %v191_v38 = vmax.f32 %v145_v30, 0.0  ;;  %v193_v39 = vmax.f32 %v186_v31, 0.0 }
  0xf4   :  { %v194_v44 = vpack.c.bf16 %v190_v34, %v190_v34  ;;  %v196_v45 = vpack.c.bf16 %v192_v35, %v192_v35 }
  0xf5   :  { %v195_v40 = vpack.c.bf16 %v191_v38, %v191_v38  ;;  %v197_v41 = vpack.c.bf16 %v193_v39, %v193_v39 }
  0xf7   :  { %467 = vmatprep.mubr.bf16.mxu0 %v195_v40  ;;  %685 = vmatprep.mubr.bf16.mxu1 %v197_v41 }
  0xf8   :  { %468 = vmatmul.mubr.bf16.vlgmr.msra.gmra.mrb[4].mxu0 %v194_v44  ;;  %686 = vmatmul.mubr.bf16.vlgmr.msra.gmra.mrb[4].mxu1 %v196_v45  ;;  %v1155_v44 = vld [vmem:[%s1536_s3 + $0x2] ss:$0 sm:$0xff] }
  0xf9   :  { %1157 = vmatpush3.bf16.msra.mxu0 %v1314_v42  ;;  %1179 = vmatpush3.bf16.msra.mxu1 %v1315_v43 }
  0xfa   :  { %1158 = vmatprep.subr.bf16.mxu0 %v1316_v46  ;;  %1180 = vmatprep.subr.bf16.mxu1 %v1317_v47 }
  0xfd   :  { %1159 = vmatpush3.bf16.msra.mxu0 %v1318_v48  ;;  %1181 = vmatpush3.bf16.msra.mxu1 %v1319_v49 }
  0xfe   :  { %1160 = vmatprep.subr.bf16.mxu0 %v1320_v50  ;;  %1182 = vmatprep.subr.bf16.mxu1 %v1321_v51 }
 0x101   :  { %1161 = vmatpush3.bf16.msra.mxu0 %v1322_v52  ;;  %1183 = vmatpush3.bf16.msra.mxu1 %v1323_v53 }
 0x102   :  { %1162 = vmatprep.subr.bf16.mxu0 %v1324_v54  ;;  %1184 = vmatprep.subr.bf16.mxu1 %v1325_v55 }
 0x105   :  { %1163 = vmatpush3.bf16.msra.mxu0 %v1326_v56  ;;  %1185 = vmatpush3.bf16.msra.mxu1 %v1327_v57 }
 0x106   :  { %1164 = vmatprep.subr.bf16.mxu0 %v1328_v58  ;;  %1186 = vmatprep.subr.bf16.mxu1 %v1329_v59 }
 0x109   :  { %1165 = vmatpush3.bf16.msra.mxu0 %v1330_v60  ;;  %1187 = vmatpush3.bf16.msra.mxu1 %v1331_v61 }
 0x10a   :  { %1166 = vmatprep.subr.bf16.mxu0 %v1332_v62  ;;  %1188 = vmatprep.subr.bf16.mxu1 %v1333_v63 }
 0x10d   :  { %1167 = vmatpush3.bf16.msra.mxu0 %v1334_v0  ;;  %1189 = vmatpush3.bf16.msra.mxu1 %v1335_v1 }
 0x10e   :  { %1168 = vmatprep.subr.bf16.mxu0 %v1336_v2  ;;  %1190 = vmatprep.subr.bf16.mxu1 %v1337_v3 }
 0x111   :  { %1169 = vmatpush3.bf16.msra.mxu0 %v1338_v4  ;;  %1191 = vmatpush3.bf16.msra.mxu1 %v1339_v5 }
 0x112   :  { %1170 = vmatprep.subr.bf16.mxu0 %v1340_v6  ;;  %1192 = vmatprep.subr.bf16.mxu1 %v1341_v7 }
 0x115   :  { %1171 = vmatpush3.bf16.msra.mxu0 %v1342_v8  ;;  %1193 = vmatpush3.bf16.msra.mxu1 %v1343_v9 }
 0x1cb   :  { %v469_v17 = vpop.f32.mrb[4].mxu0  ;;  %v687_v19 = vpop.f32.mrb[4].mxu1 }
 0x1cc   :  { %v470_v20 = vadd.f32 %v469_v17, %v268_v12  ;;  %v688_v21 = vadd.f32 %v687_v19, %v486_v13  ;;  %v471_v22 = vpop.f32.mrb[5].mxu0  ;;  %v689_v23 = vpop.f32.mrb[5].mxu1 }
 0x1cd   :  { %v472_v24 = vadd.f32 %v471_v22, %v272_v14  ;;  %v690_v25 = vadd.f32 %v689_v23, %v490_v16  ;;  %v473_v26 = vpop.f32.mrb[6].mxu0  ;;  %v691_v27 = vpop.f32.mrb[6].mxu1 }
 0x1ce   :  { %v476_v28 = vmax.f32 %v470_v20, 0.0  ;;  %v694_v29 = vmax.f32 %v688_v21, 0.0  ;;  %v474_v30 = vpop.f32.mrb[7].mxu0  ;;  %v692_v31 = vpop.f32.mrb[7].mxu1 }
 0x1cf   :  { %v477_v32 = vmax.f32 %v472_v24, 0.0  ;;  %v695_v15 = vmax.f32 %v690_v25, 0.0 }
 0x1d0   :  { %v478_v35 = vpack.c.bf16 %v476_v28, %v476_v28  ;;  %v696_v18 = vpack.c.bf16 %v694_v29, %v694_v29 }
 0x1d1   :  { %v479_v33 = vpack.c.bf16 %v477_v32, %v477_v32  ;;  %v697_v34 = vpack.c.bf16 %v695_v15, %v695_v15 }
 0x1d3   :  { %890 = vmatprep.mubr.bf16.mxu0 %v697_v34  ;;  %1026 = vmatprep.mubr.bf16.mxu1 %v479_v33 }
 0x1d4   :  { %891 = vmatmul.mubr.bf16.vlgmr.msra.gmra.mrb[8].mxu0 %v696_v18  ;;  %1027 = vmatmul.mubr.bf16.vlgmr.msra.gmra.mrb[8].mxu1 %v478_v35 }
 0x2a7   :  { %v1172_v36 = vpop.f32.mrb[8].mxu0  ;;  %v1194_v37 = vpop.f32.mrb[8].mxu1 }
 0x2a8   :  { %v1173_v38 = vpop.f32.mrb[9].mxu0  ;;  %v1195_v39 = vpop.f32.mrb[9].mxu1 }
 0x2a9   :  { %v1174_v40 = vadd.f32 %v1173_v38, %v1172_v36  ;;  %v1196_v41 = vadd.f32 %v1195_v39, %v1194_v37  ;;  %v1175_v42 = vpop.f32.mrb[10].mxu0  ;;  %v1197_v43 = vpop.f32.mrb[10].mxu1 }
 0x2aa   :  { %v1176_v45 = vpop.f32.mrb[11].mxu0  ;;  %v1198_v46 = vpop.f32.mrb[11].mxu1 }
 0x2ab   :  { %v1029_v47 = vadd.f32 %v1196_v41, %v1174_v40 }
 0x2ad   :  { %v1039_v48 = vadd.f32 %v1155_v44, %v1029_v47 }
 0x2af   :  { %1041 = vst.msk [vmem:[%s1537_s4] sm:$0xff] %vm1040_vm1, %v1039_v48 }
 0x2b0   :  { %1046 = vsyncpa [#allocation3], 1 }

</bundles_post_ra>
